<compile_context>
chip_gen: v7x
topology: tpu7x:2x2x1
jax: 0.10.0
libtpu: 0.0.40
codegen_flags: <defaults>
</compile_context>

<pallas_src>
import functools

import jax
import jax.numpy as jnp
from jax.experimental import pallas as pl
from jax.experimental.pallas import tpu as pltpu

LANE = 128
_TILE_B_CAP = 512  # largest batch tile (v6e/v7x guidance); v5e is fine too.


def _round_up(n, m):
    return ((n + m - 1) // m) * m


def _pick_tile_b(batch):
    """Never shrink the batch tile below an MXU-filling M just to get >=2
    grid steps: a single tile covers the whole (8-aligned) batch until it
    exceeds the cap; above the cap we split into 512-row (>=128-row) pieces."""
    if batch <= _TILE_B_CAP:
        return _round_up(batch, 8)
    return _TILE_B_CAP


def _mlp_kernel(x_ref, w1_ref, b1_ref, w2_ref, b2_ref, o_ref):
    # x_ref : [TB, D]   f32      w1_ref: [D, Hp]  bf16    b1_ref: [1, Hp] f32
    # w2_ref: [Hp, Cp]  bf16     b2_ref: [1, Cp]  f32     o_ref : [TB, Cp] f32
    # Cast x to bf16 in-register (free under a mem-bound regime), matmul on
    # the MXU with f32 accumulation, bias + ReLU on the VPU in f32.
    x = x_ref[...].astype(jnp.bfloat16)
    h = jnp.dot(x, w1_ref[...], preferred_element_type=jnp.float32)
    h = jnp.maximum(h + b1_ref[...], 0.0)
    out = jnp.dot(h.astype(w2_ref.dtype), w2_ref[...],
                  preferred_element_type=jnp.float32)
    o_ref[...] = (out + b2_ref[...]).astype(o_ref.dtype)


def prepare_params(w1, b1, w2, b2):
    """One-time (init / param-load) padding + bf16 cast of the weights.

    Pads H and C (num_classes) to multiples of 128 lanes with zeros
    (semantics-preserving: ReLU(0 + 0) = 0 and the padded w2 rows are zero).
    Returns (w1_p, b1_p, w2_p, b2_p).
    """
    D_in, H = w1.shape
    C = w2.shape[1]
    H_pad = _round_up(H, LANE)
    C_pad = _round_up(C, LANE)

    w1_p = jnp.zeros((D_in, H_pad), jnp.bfloat16)
    w1_p = w1_p.at[:, :H].set(w1.astype(jnp.bfloat16))
    b1_p = jnp.zeros((1, H_pad), jnp.float32)
    b1_p = b1_p.at[:, :H].set(jnp.asarray(b1, jnp.float32).reshape(1, H))

    w2_p = jnp.zeros((H_pad, C_pad), jnp.bfloat16)
    w2_p = w2_p.at[:H, :C].set(w2.astype(jnp.bfloat16))
    b2_p = jnp.zeros((1, C_pad), jnp.float32)
    b2_p = b2_p.at[:, :C].set(jnp.asarray(b2, jnp.float32).reshape(1, C))
    return w1_p, b1_p, w2_p, b2_p


@functools.partial(jax.jit, static_argnames=("num_classes", "tile_b"))
def neural_layer_forward(x, w1_p, b1_p, w2_p, b2_p, *, num_classes, tile_b=None):
    """x: [B, D_in] f32 (unpadded). Padded params from prepare_params()."""
    B, D_in = x.shape
    H_pad = w1_p.shape[1]
    C_pad = w2_p.shape[1]

    if tile_b is None:
        tile_b = _pick_tile_b(B)

    grid = (pl.cdiv(B, tile_b),)
    b_work = grid[0] * tile_b  # rows actually processed (incl. ragged padding)

    # Advisory cost model so XLA can overlap neighboring ops with the call.
    flops = 2 * b_work * (D_in * H_pad + H_pad * C_pad)
    bytes_accessed = (B * D_in * 4                       # x read (f32)
                      + D_in * H_pad * 2 + H_pad * 4     # w1, b1
                      + H_pad * C_pad * 2 + C_pad * 4    # w2, b2
                      + B * C_pad * 4)                   # output write
    cost = pl.CostEstimate(flops=flops, transcendentals=0,
                           bytes_accessed=bytes_accessed)

    # Scoped-VMEM budget: double-buffered x/out tiles + (double-buffered)
    # resident weights + f32/bf16 intermediates, with headroom.  Floor at the
    # 32 MiB default, cap at 64 MiB (safe on v5e/v6e/v7x physical VMEM).
    needed = (2 * tile_b * D_in * 4          # x tile double-buffer (f32)
              + 2 * tile_b * C_pad * 4       # out tile double-buffer (f32)
              + 2 * (D_in * H_pad * 2 + H_pad * 4 + H_pad * C_pad * 2 + C_pad * 4)
              + tile_b * H_pad * 8           # f32 h + bf16 copy
              + tile_b * D_in * 2)           # bf16 cast of x
    vmem_limit = int(min(max(needed * 3 // 2 + (4 << 20), 32 << 20), 64 << 20))

    out = pl.pallas_call(
        _mlp_kernel,
        out_shape=jax.ShapeDtypeStruct((B, C_pad), jnp.float32),
        grid_spec=pltpu.PrefetchScalarGridSpec(
            num_scalar_prefetch=0,
            grid=grid,
            in_specs=[
                pl.BlockSpec((tile_b, D_in), lambda i: (i, 0)),   # x tile (f32)
                pl.BlockSpec((D_in, H_pad), lambda i: (0, 0)),    # w1 (resident)
                pl.BlockSpec((1, H_pad), lambda i: (0, 0)),       # b1 (resident)
                pl.BlockSpec((H_pad, C_pad), lambda i: (0, 0)),   # w2 (resident)
                pl.BlockSpec((1, C_pad), lambda i: (0, 0)),       # b2 (resident)
            ],
            out_specs=pl.BlockSpec((tile_b, C_pad), lambda i: (i, 0)),
        ),
        compiler_params=pltpu.CompilerParams(
            dimension_semantics=("parallel",),
            vmem_limit_bytes=vmem_limit),
        cost_estimate=cost,
    )(x, w1_p, b1_p, w2_p, b2_p)

    return out[:, :num_classes]


def init_params(key, input_dimension, intermediate_dimension, num_classes):
    """Deterministic PyTorch-style (uniform +-1/sqrt(fan_in)) init for the two Linears."""
    k1, k2, k3, k4 = jax.random.split(key, 4)
    bound1 = 1.0 / jnp.sqrt(input_dimension)
    bound2 = 1.0 / jnp.sqrt(intermediate_dimension)
    # Weights stored pre-transposed: [in, out] so the kernel does x @ w.
    w1 = jax.random.uniform(k1, (input_dimension, intermediate_dimension),
                            jnp.float32, -bound1, bound1)
    b1 = jax.random.uniform(k2, (1, intermediate_dimension),
                            jnp.float32, -bound1, bound1)
    w2 = jax.random.uniform(k3, (intermediate_dimension, num_classes),
                            jnp.float32, -bound2, bound2)
    b2 = jax.random.uniform(k4, (1, num_classes),
                            jnp.float32, -bound2, bound2)
    return w1, b1, w2, b2


if __name__ == "__main__":
    # Small shapes consistent with the module: Linear(D_in -> H) -> ReLU -> Linear(H -> 41)
    B, D_in, H, C = 32, 256, 128, 41

    key = jax.random.PRNGKey(0)
    kx, kp = jax.random.split(key)
    x = jax.random.normal(kx, (B, D_in), jnp.float32)
    w1, b1, w2, b2 = init_params(kp, D_in, H, C)

    # Pad/cast the parameters once (would be done at model init in practice).
    w1_p, b1_p, w2_p, b2_p = prepare_params(w1, b1, w2, b2)

    out = neural_layer_forward(x, w1_p, b1_p, w2_p, b2_p, num_classes=C)
    out = jax.block_until_ready(out)
    assert out.shape == (B, C), out.shape

    # Reference that matches the kernel's bf16-operand / f32-accumulate math.
    xb, w1b, w2b = (t.astype(jnp.bfloat16) for t in (x, w1, w2))
    h_ref = jnp.maximum(
        jnp.dot(xb, w1b, preferred_element_type=jnp.float32) + b1, 0.0)
    ref_bf16 = jnp.dot(h_ref.astype(jnp.bfloat16), w2b,
                       preferred_element_type=jnp.float32) + b2
    assert jnp.allclose(out, ref_bf16, atol=1e-2, rtol=1e-2), "mismatch vs bf16 reference"

    # Looser sanity check against the pure-f32 reference (bf16 rounding of operands).
    ref_f32 = jnp.maximum(x @ w1 + b1, 0.0) @ w2 + b2
    assert jnp.allclose(out, ref_f32, atol=1e-1, rtol=1e-1), "mismatch vs f32 reference"

    print("KERNEL_OK")
</pallas_src>

<mosaic_0001>
module attributes {stable_mosaic.version = 11 : i64} {
  func.func @_mlp_kernel(%arg0: i32, %arg1: memref<32x256xf32, #tpu.memory_space<vmem>>, %arg2: memref<256x128xbf16, #tpu.memory_space<vmem>>, %arg3: memref<1x128xf32, #tpu.memory_space<vmem>>, %arg4: memref<128x128xbf16, #tpu.memory_space<vmem>>, %arg5: memref<1x128xf32, #tpu.memory_space<vmem>>, %arg6: memref<32x128xf32, #tpu.memory_space<vmem>>) attributes {dimension_semantics = [#tpu.dimension_semantics<parallel>], iteration_bounds = array<i64: 1>, scalar_prefetch = 0 : i64, scratch_operands = 0 : i64, tpu.core_type = #tpu.core_type<tc>, window_params = [{transform_indices = @transform_0, window_bounds = array<i64: 32, 256>}, {pipeline_mode = #tpu.pipeline_mode<synchronous>, transform_indices = @transform_1, window_bounds = array<i64: 256, 128>}, {pipeline_mode = #tpu.pipeline_mode<synchronous>, transform_indices = @transform_2, window_bounds = array<i64: 1, 128>}, {pipeline_mode = #tpu.pipeline_mode<synchronous>, transform_indices = @transform_3, window_bounds = array<i64: 128, 128>}, {pipeline_mode = #tpu.pipeline_mode<synchronous>, transform_indices = @transform_4, window_bounds = array<i64: 1, 128>}, {transform_indices = @transform_5, window_bounds = array<i64: 32, 128>}]} {
    %c0 = arith.constant 0 : index
    %c0_0 = arith.constant 0 : index
    %0 = vector.load %arg1[%c0, %c0_0] : memref<32x256xf32, #tpu.memory_space<vmem>>, vector<32x256xf32>
    %1 = arith.truncf %0 : vector<32x256xf32> to vector<32x256xbf16>
    %c0_1 = arith.constant 0 : index
    %c0_2 = arith.constant 0 : index
    %2 = vector.load %arg2[%c0_1, %c0_2] : memref<256x128xbf16, #tpu.memory_space<vmem>>, vector<256x128xbf16>
    %cst = arith.constant dense<0.000000e+00> : vector<32x128xf32>
    %3 = tpu.matmul %1, %2, %cst {dimension_numbers = #tpu.dot_dimension_numbers<[1], [0], [0], [1], [0, 0, 1, 1], [], []>} : vector<32x256xbf16>, vector<256x128xbf16>, vector<32x128xf32> -> vector<32x128xf32>
    %c0_3 = arith.constant 0 : index
    %c0_4 = arith.constant 0 : index
    %4 = vector.load %arg3[%c0_3, %c0_4] : memref<1x128xf32, #tpu.memory_space<vmem>>, vector<1x128xf32>
    %5 = vector.broadcast %4 : vector<1x128xf32> to vector<32x128xf32>
    %6 = arith.addf %3, %5 : vector<32x128xf32>
    %cst_5 = arith.constant 0.000000e+00 : f32
    %7 = vector.broadcast %cst_5 : f32 to vector<32x128xf32>
    %8 = arith.maximumf %6, %7 : vector<32x128xf32>
    %9 = arith.truncf %8 : vector<32x128xf32> to vector<32x128xbf16>
    %c0_6 = arith.constant 0 : index
    %c0_7 = arith.constant 0 : index
    %10 = vector.load %arg4[%c0_6, %c0_7] : memref<128x128xbf16, #tpu.memory_space<vmem>>, vector<128x128xbf16>
    %cst_8 = arith.constant dense<0.000000e+00> : vector<32x128xf32>
    %11 = tpu.matmul %9, %10, %cst_8 {dimension_numbers = #tpu.dot_dimension_numbers<[1], [0], [0], [1], [0, 0, 1, 1], [], []>} : vector<32x128xbf16>, vector<128x128xbf16>, vector<32x128xf32> -> vector<32x128xf32>
    %c0_9 = arith.constant 0 : index
    %c0_10 = arith.constant 0 : index
    %12 = vector.load %arg5[%c0_9, %c0_10] : memref<1x128xf32, #tpu.memory_space<vmem>>, vector<1x128xf32>
    %13 = vector.broadcast %12 : vector<1x128xf32> to vector<32x128xf32>
    %14 = arith.addf %11, %13 : vector<32x128xf32>
    %c0_11 = arith.constant 0 : index
    %c0_12 = arith.constant 0 : index
    %15 = vector.load %arg6[%c0_11, %c0_12] : memref<32x128xf32, #tpu.memory_space<vmem>>, vector<32x128xf32>
    tpu.vector_store %arg6[%c0_11, %c0_12], %14 {strides = array<i32>} : memref<32x128xf32, #tpu.memory_space<vmem>>, vector<32x128xf32>,
    return
  }
  func.func @transform_0(%arg0: i32) -> (i32, i32) {
    %c0_i32 = arith.constant 0 : i32
    %c0_i32_0 = arith.constant 0 : i32
    return %arg0, %c0_i32 : i32, i32
  }
  func.func @transform_1(%arg0: i32) -> (i32, i32) {
    %c0_i32 = arith.constant 0 : i32
    %c0_i32_0 = arith.constant 0 : i32
    %c0_i32_1 = arith.constant 0 : i32
    return %c0_i32, %c0_i32_0 : i32, i32
  }
  func.func @transform_2(%arg0: i32) -> (i32, i32) {
    %c0_i32 = arith.constant 0 : i32
    %c0_i32_0 = arith.constant 0 : i32
    %c0_i32_1 = arith.constant 0 : i32
    return %c0_i32, %c0_i32_0 : i32, i32
  }
  func.func @transform_3(%arg0: i32) -> (i32, i32) {
    %c0_i32 = arith.constant 0 : i32
    %c0_i32_0 = arith.constant 0 : i32
    %c0_i32_1 = arith.constant 0 : i32
    return %c0_i32, %c0_i32_0 : i32, i32
  }
  func.func @transform_4(%arg0: i32) -> (i32, i32) {
    %c0_i32 = arith.constant 0 : i32
    %c0_i32_0 = arith.constant 0 : i32
    %c0_i32_1 = arith.constant 0 : i32
    return %c0_i32, %c0_i32_0 : i32, i32
  }
  func.func @transform_5(%arg0: i32) -> (i32, i32) {
    %c0_i32 = arith.constant 0 : i32
    %c0_i32_0 = arith.constant 0 : i32
    return %arg0, %c0_i32 : i32, i32
  }
}

</mosaic_0001>

<bundles_post_ra>
// kernel: neural_layer_forward.1
= control target key start
LH: loop header
LB: loop body
LE: loop exit
PB: predicated region body
PF: predicated region fallthrough
CT: control target
= control target key end

     0   :  { %10 = vsyncpa [#allocation3], 0  ;;  %s719_s0 = inlined_call_operand.hbm [shape: f32[32,256], index: 0, kind: input, shape index: {}]   ;;  %s720_s1 = inlined_call_operand.hbm [shape: bf16[256,128], index: 1, kind: input, shape index: {}]   ;;  %s721_s2 = inlined_call_operand.vmem [shape: f32[1,128], index: 2, kind: input, shape index: {}]   ;;  %s722_s3 = inlined_call_operand.hbm [shape: bf16[128,128], index: 3, kind: input, shape index: {}]   ;;  %s723_s4 = inlined_call_operand.vmem [shape: f32[1,128], index: 4, kind: input, shape index: {}]   ;;  %s724_s5 = inlined_call_operand.hbm [shape: f32[32,128], index: 5, kind: output, shape index: {}]  }
   0x1   :  { %11 = vsyncpa [#allocation6], 0 }
   0x2   :  { %12 = vsyncpa [#allocation4], 0  ;;  %s619_s18 = smov [#allocation5]   ;;  %s525_s22 = scalar_lea.hbm %s720_s1, 2048 }
   0x3   :  { %s30_s19 = sshll.u32 %s619_s18, 4  ;;  %p526_p0 = scmp.ne.s32.totalorder %s720_s1, %s525_s22  ;;  %s31_s19 = int_to_ptr.vmem [resolvable:$true] %s30_s19 }
   0x4   :  { %p529_p1 = scmp.lt.u32.totalorder %s525_s22, %s720_s1 }
   0x6   :  { %p531_p2 = pnand %p529_p1, %p526_p0 }
   0x8   :  { %534 = shalt.err (!%p531_p2)
}
   0x9   :  { %s535_s27 = scalar_lea.vmem %s31_s19, 2048  ;;  %p540_p4 = scmp.lt.s32.totalorder %s31_s19, %s31_s19 }
   0xa   :  { %p536_p3 = scmp.ne.s32.totalorder %s31_s19, %s535_s27  ;;  %p541_p5 = scmp.lt.s32.totalorder %s535_s27, %s535_s27 }
   0xc   :  { %p542_p6 = por %p541_p5, %p540_p4 }
   0xe   :  { %p543_p7 = pnand %p542_p6, %p536_p3 }
  0x10   :  { %546 = shalt.err (!%p543_p7)
}
  0x11   :  { %s620_s28 = smov 64   ;;  %s621_s29 = smov 4  }
  0x12   :  { %36 = dma.hbm_to_vmem [thread:$0]  %s720_s1, 2048, %s31_s19, [#allocation6], %s620_s28, %s620_s28, %s621_s29  }
  0x13   :  { %s622_s7 = smov [#allocation2]   ;;  %s547_s11 = scalar_lea.hbm %s719_s0, 1024 }
  0x14   :  { %s18_s8 = sshll.u32 %s622_s7, 4  ;;  %p548_p8 = scmp.ne.s32.totalorder %s719_s0, %s547_s11  ;;  %s19_s8 = int_to_ptr.vmem [resolvable:$true] %s18_s8 }
  0x15   :  { %p551_p9 = scmp.lt.u32.totalorder %s547_s11, %s719_s0 }
  0x17   :  { %p553_p10 = pnand %p551_p9, %p548_p8 }
  0x19   :  { %556 = shalt.err (!%p553_p10)
}
  0x1a   :  { %s557_s16 = scalar_lea.vmem %s19_s8, 1024  ;;  %p562_p12 = scmp.lt.s32.totalorder %s19_s8, %s19_s8 }
  0x1b   :  { %p558_p11 = scmp.ne.s32.totalorder %s19_s8, %s557_s16  ;;  %p563_p13 = scmp.lt.s32.totalorder %s557_s16, %s557_s16 }
  0x1d   :  { %p564_p0 = por %p563_p13, %p562_p12 }
  0x1f   :  { %p565_p1 = pnand %p564_p0, %p558_p11 }
  0x21   :  { %568 = shalt.err (!%p565_p1)
}
  0x22   :  { %s623_s1 = smov 256   ;;  %s624_s17 = smov 16  }
  0x23   :  { %24 = dma.hbm_to_vmem [thread:$0]  %s719_s0, 1024, %s19_s8, [#allocation3], %s623_s1, %s623_s1, %s624_s17  }
  0x24   :  { %s625_s20 = smov [#allocation7]   ;;  %s569_s24 = scalar_lea.hbm %s722_s3, 1024 }
  0x25   :  { %s44_s21 = sshll.u32 %s625_s20, 4  ;;  %p570_p2 = scmp.ne.s32.totalorder %s722_s3, %s569_s24  ;;  %s45_s21 = int_to_ptr.vmem [resolvable:$true] %s44_s21 }
  0x26   :  { %p573_p3 = scmp.lt.u32.totalorder %s569_s24, %s722_s3 }
  0x28   :  { %p575_p4 = pnand %p573_p3, %p570_p2 }
  0x2a   :  { %578 = shalt.err (!%p575_p4)
}
  0x2b   :  { %s579_s6 = scalar_lea.vmem %s45_s21, 1024  ;;  %p584_p6 = scmp.lt.s32.totalorder %s45_s21, %s45_s21 }
  0x2c   :  { %p580_p5 = scmp.ne.s32.totalorder %s45_s21, %s579_s6  ;;  %p585_p7 = scmp.lt.s32.totalorder %s579_s6, %s579_s6 }
  0x2e   :  { %p586_p8 = por %p585_p7, %p584_p6 }
  0x30   :  { %p587_p9 = pnand %p586_p8, %p580_p5 }
  0x32   :  { %590 = shalt.err (!%p587_p9)
}
  0x33   :  { %50 = dma.hbm_to_vmem [thread:$0]  %s722_s3, 1024, %s45_s21, [#allocation6], %s620_s28, %s620_s28, %s621_s29  }
  0x34   :  { %613 = dma.done.wait [#allocation3], 1024  }
  0x35   :  { %614 = vsyncadd [#allocation3], 4294966272 }
  0x36   :  { %615 = dma.done.wait [#allocation6], 3072  }
  0x37   :  { %616 = vsyncadd [#allocation6], 4294964224  ;;  %v501_v0 = vld [vmem:[#allocation5 + $0x40] sm:$0xff]   ;;  %v503_v2 = vld [vmem:[#allocation5 + $0x48] sm:$0xff]   ;;  %s626_s8 = smov [#allocation8]  }
  0x38   :  { %v502_v1 = vld [vmem:[#allocation5] sm:$0xff]   ;;  %433 = vmatprep.subr.bf16.mxu0 %v501_v0  ;;  %v504_v3 = vld [vmem:[#allocation5 + $0x8] sm:$0xff]   ;;  %v505_v4 = vld [vmem:[#allocation5 + $0x50] sm:$0xff]   ;;  %s394_s9 = sshll.u32 %s626_s8, 4  ;;  %s395_s9 = int_to_ptr.vmem [resolvable:$true] %s394_s9 }
  0x39   :  { %434 = vmatpush3.bf16.msra.mxu0 %v502_v1  ;;  %v506_v5 = vld [vmem:[#allocation5 + $0x10] sm:$0xff]   ;;  %v507_v6 = vld [vmem:[#allocation5 + $0x58] sm:$0xff]   ;;  %v509_v8 = vld [vmem:[#allocation5 + $0x60] sm:$0xff]   ;;  %s591_s10 = scalar_lea.vmem %s395_s9, 512  ;;  %p596_p11 = scmp.lt.s32.totalorder %s395_s9, %s395_s9 }
  0x3a   :  { %435 = vmatprep.subr.bf16.mxu0 %v503_v2  ;;  %v508_v7 = vld [vmem:[#allocation5 + $0x18] sm:$0xff]   ;;  %v510_v9 = vld [vmem:[#allocation5 + $0x20] sm:$0xff]   ;;  %v511_v10 = vld [vmem:[#allocation5 + $0x68] sm:$0xff]   ;;  %p592_p10 = scmp.ne.s32.totalorder %s395_s9, %s591_s10  ;;  %p597_p12 = scmp.lt.s32.totalorder %s591_s10, %s591_s10 }
  0x3b   :  { %v64_v11 = vld [vmem:[#allocation2 + $0x8] sm:$0xff]  ;;  %v66_v12 = vld [vmem:[#allocation2 + $0x18] sm:$0xff]  ;;  %v513_v15 = vld [vmem:[#allocation5 + $0x70] sm:$0xff]  }
  0x3c   :  { %v72_v13 = vpack.c.bf16 %v66_v12, %v64_v11  ;;  %v512_v14 = vld [vmem:[#allocation5 + $0x28] sm:$0xff]   ;;  %v517_v16 = vld [vmem:[#allocation7] sm:$0xff]   ;;  %v514_v18 = vld [vmem:[#allocation5 + $0x30] sm:$0xff]   ;;  %p598_p13 = por %p597_p12, %p596_p11 }
  0x3d   :  { %436 = vmatpush3.bf16.msra.mxu0 %v504_v3  ;;  %v518_v17 = vld [vmem:[#allocation7 + $0x8] sm:$0xff]   ;;  %471 = vmatprep.subr.bf16.mxu1 %v517_v16  ;;  %v519_v19 = vld [vmem:[#allocation7 + $0x10] sm:$0xff]   ;;  %v515_v20 = vld [vmem:[#allocation5 + $0x78] sm:$0xff]  }
  0x3e   :  { %437 = vmatprep.subr.bf16.mxu0 %v505_v4  ;;  %242 = vmatprep.mubr.bf16.mxu0 %v72_v13  ;;  %v516_v21 = vld [vmem:[#allocation5 + $0x38] sm:$0xff]   ;;  %v63_v22 = vld [vmem:[#allocation2] sm:$0xff]  ;;  %v65_v23 = vld [vmem:[#allocation2 + $0x10] sm:$0xff]  ;;  %p599_p0 = pnand %p598_p13, %p592_p10 }
  0x3f   :  { %472 = vmatpush3.bf16.msra.mxu1 %v517_v16  ;;  %v68_v24 = vld [vmem:[#allocation2 + $0x28] sm:$0xff]  ;;  %v70_v25 = vld [vmem:[#allocation2 + $0x38] sm:$0xff]  ;;  %v71_v26 = vpack.c.bf16 %v65_v23, %v63_v22  ;;  %v67_v28 = vld [vmem:[#allocation2 + $0x20] sm:$0xff] }
  0x40   :  { %473 = vmatprep.subr.bf16.mxu1 %v518_v17  ;;  %v74_v27 = vpack.c.bf16 %v70_v25, %v68_v24  ;;  %v69_v29 = vld [vmem:[#allocation2 + $0x30] sm:$0xff]  ;;  %v520_v31 = vld [vmem:[#allocation7 + $0x18] sm:$0xff]   ;;  %v521_v32 = vld [vmem:[#allocation7 + $0x20] sm:$0xff]  }
  0x41   :  { %438 = vmatpush3.bf16.msra.mxu0 %v506_v5  ;;  %v73_v30 = vpack.c.bf16 %v69_v29, %v67_v28  ;;  %v522_v33 = vld [vmem:[#allocation7 + $0x28] sm:$0xff]   ;;  %v523_v34 = vld [vmem:[#allocation7 + $0x30] sm:$0xff]   ;;  %v524_v35 = vld [vmem:[#allocation7 + $0x38] sm:$0xff]  }
  0x42   :  { %439 = vmatprep.subr.bf16.mxu0 %v507_v6  ;;  %v407_v38 = vld [vmem:[%s721_s2] ss:$0 sm:$0xff] }
  0x43   :  { %474 = vmatpush3.bf16.msra.mxu1 %v518_v17  ;;  %v424_v59 = vld [vmem:[%s723_s4] ss:$0 sm:$0xff] }
  0x44   :  { %475 = vmatprep.subr.bf16.mxu1 %v519_v19 }
  0x45   :  { %440 = vmatpush3.bf16.msra.mxu0 %v508_v7 }
  0x46   :  { %441 = vmatprep.subr.bf16.mxu0 %v509_v8 }
  0x47   :  { %476 = vmatpush3.bf16.msra.mxu1 %v519_v19 }
  0x48   :  { %477 = vmatprep.subr.bf16.mxu1 %v520_v31 }
  0x49   :  { %442 = vmatpush3.bf16.msra.mxu0 %v510_v9 }
  0x4a   :  { %443 = vmatprep.subr.bf16.mxu0 %v511_v10 }
  0x4b   :  { %478 = vmatpush3.bf16.msra.mxu1 %v520_v31 }
  0x4c   :  { %479 = vmatprep.subr.bf16.mxu1 %v521_v32 }
  0x4d   :  { %444 = vmatpush3.bf16.msra.mxu0 %v512_v14 }
  0x4e   :  { %445 = vmatprep.subr.bf16.mxu0 %v513_v15 }
  0x4f   :  { %480 = vmatpush3.bf16.msra.mxu1 %v521_v32 }
  0x50   :  { %481 = vmatprep.subr.bf16.mxu1 %v522_v33 }
  0x51   :  { %446 = vmatpush3.bf16.msra.mxu0 %v514_v18 }
  0x52   :  { %447 = vmatprep.subr.bf16.mxu0 %v515_v20 }
  0x53   :  { %482 = vmatpush3.bf16.msra.mxu1 %v522_v33 }
  0x54   :  { %483 = vmatprep.subr.bf16.mxu1 %v523_v34 }
  0x55   :  { %448 = vmatpush3.bf16.msra.mxu0 %v516_v21 }
  0x57   :  { %484 = vmatpush3.bf16.msra.mxu1 %v523_v34 }
  0x58   :  { %243 = vmatmul.mubr.bf16.vlgmr.msra.gmra.mrb[0].mxu0 %v71_v26  ;;  %485 = vmatprep.subr.bf16.mxu1 %v524_v35 }
  0x59   :  { %250 = vmatprep.mubr.bf16.mxu0 %v74_v27 }
  0x5b   :  { %486 = vmatpush3.bf16.msra.mxu1 %v524_v35 }
  0x60   :  { %251 = vmatmul.mubr.bf16.gmra.mrb[4].mxu0 %v73_v30 }
 0x12b   :  { %v449_v36 = vpop.f32.mrb[0].mxu0 }
 0x12c   :  { %v450_v37 = vpop.f32.mrb[1].mxu0 }
 0x12d   :  { %v451_v39 = vadd.f32 %v450_v37, %v449_v36  ;;  %v452_v40 = vpop.f32.mrb[2].mxu0 }
 0x12e   :  { %v453_v41 = vpop.f32.mrb[3].mxu0 }
 0x12f   :  { %v454_v42 = vadd.f32 %v453_v41, %v452_v40  ;;  %v245_v43 = vadd.f32 %v451_v39, %v407_v38 }
 0x131   :  { %v248_v44 = vadd.f32 %v454_v42, %v407_v38  ;;  %v259_v46 = vmax.f32 %v245_v43, 0.0 }
 0x133   :  { %v455_v45 = vpop.f32.mrb[4].mxu0  ;;  %v260_v47 = vmax.f32 %v248_v44, 0.0 }
 0x134   :  { %v456_v48 = vpop.f32.mrb[5].mxu0 }
 0x135   :  { %v457_v49 = vadd.f32 %v456_v48, %v455_v45  ;;  %v458_v50 = vpop.f32.mrb[6].mxu0  ;;  %v263_v51 = vpack.c.bf16 %v260_v47, %v259_v46 }
 0x136   :  { %v459_v52 = vpop.f32.mrb[7].mxu0 }
 0x137   :  { %v253_v53 = vadd.f32 %v457_v49, %v407_v38  ;;  %v460_v54 = vadd.f32 %v459_v52, %v458_v50  ;;  %487 = vmatprep.mubr.bf16.mxu1 %v263_v51 }
 0x139   :  { %v256_v55 = vadd.f32 %v460_v54, %v407_v38  ;;  %v261_v56 = vmax.f32 %v253_v53, 0.0 }
 0x13b   :  { %v262_v57 = vmax.f32 %v256_v55, 0.0 }
 0x13d   :  { %v264_v58 = vpack.c.bf16 %v262_v57, %v261_v56 }
 0x13f   :  { %488 = vmatmul.mubr.bf16.vlgmr.msra.gmra.mrb[0].mxu1 %v264_v58 }
 0x212   :  { %v489_v60 = vpop.f32.mrb[0].mxu1 }
 0x213   :  { %v379_v61 = vadd.f32 %v489_v60, %v424_v59  ;;  %v370_v62 = vpop.f32.mrb[1].mxu1 }
 0x214   :  { %v371_v63 = vadd.f32 %v424_v59, %v370_v62  ;;  %v490_v0 = vpop.f32.mrb[2].mxu1 }
 0x215   :  { %387 = vst [vmem:[#allocation8 + $0x10] sm:$0xff] %v379_v61  ;;  %v382_v1 = vadd.f32 %v490_v0, %v424_v59  ;;  %v373_v2 = vpop.f32.mrb[3].mxu1 }
 0x216   :  { %385 = vst [vmem:[#allocation8] sm:$0xff] %v371_v63  ;;  %v374_v3 = vadd.f32 %v424_v59, %v373_v2 }
 0x217   :  { %388 = vst [vmem:[#allocation8 + $0x18] sm:$0xff] %v382_v1 }
 0x218   :  { %386 = vst [vmem:[#allocation8 + $0x8] sm:$0xff] %v374_v3 }
 0x219   :  { %602 = shalt.err (!%p599_p0)
}
 0x21a   :  { %s603_s12 = scalar_lea.hbm %s724_s5, 512 }
 0x21b   :  { %p604_p1 = scmp.ne.s32.totalorder %s724_s5, %s603_s12  ;;  %p607_p2 = scmp.lt.u32.totalorder %s603_s12, %s724_s5 }
 0x21d   :  { %p609_p3 = pnand %p607_p2, %p604_p1 }
 0x21f   :  { %612 = shalt.err (!%p609_p3)
}
 0x220   :  { %s627_s1 = smov 128   ;;  %s628_s17 = smov 8  }
 0x221   :  { %400 = dma.vmem_to_hbm [thread:$0]  %s395_s9, 512, %s724_s5, [#allocation4], %s627_s1, %s627_s1, %s628_s17  }
 0x222   :  { %617 = dma.done.wait [#allocation4], 512  }
 0x223   :  { %618 = vsyncadd [#allocation4], 4294966784 }
 0x224   :  { %404 = vsyncpa [#allocation3], 1 }
 0x225   :  { %405 = vsyncpa [#allocation6], 1 }
 0x226   :  { %406 = vsyncpa [#allocation4], 1 }

</bundles_post_ra>
